<compile_context>
chip_gen: v5e
topology: v5e:2x2
jax: 0.10.0
libtpu: 0.0.40
codegen_flags: <defaults>
</compile_context>

<pallas_src>
import jax
import jax.numpy as jnp
import numpy as np
from jax.experimental import pallas as pl
from jax.experimental.pallas import tpu as pltpu


_STRIP = 8          # sublane strip height: every (8, TM) temporary is only a few vregs
_FILL = 1.0e8       # far-away zero-area filler box: IoU with any real box is exactly 0


def _round_up(x, mult):
    return ((x + mult - 1) // mult) * mult


def _fast_recip(x):
    """EUP approximate reciprocal + one Newton-Raphson step (rel. error ~1e-7)."""
    r = pl.reciprocal(x, approx=True)
    return r * (2.0 - x * r)


def _siou_kernel(pred_ref, tgt_ref, loss_ref, iousum_ref, colsum_ref):
    """One (TN, TM) tile of pairwise SIoU loss + the tile's raw-IoU sum.

    pred_ref  : (TN, 4)  pred boxes (x1, y1, x2, y2), rows on sublanes
    tgt_ref   : (4, TM)  target boxes, coordinates lane-aligned
    loss_ref  : (TN, TM) SIoU loss for (pred i, target j)
    iousum_ref: (1, 1)   SMEM scalar: sum of raw IoU over this tile (padding
                         contributes exactly 0 by construction of the filler boxes)
    colsum_ref: (1, TM)  VMEM scratch: per-lane raw-IoU partial sums across strips
    """
    tn = loss_ref.shape[0]

    # ---- target-side quantities, hoisted once per tile -------------------------
    tx1 = tgt_ref[0:1, :]
    ty1 = tgt_ref[1:2, :]
    tx2 = tgt_ref[2:3, :]
    ty2 = tgt_ref[3:4, :]
    tw = tx2 - tx1
    th = ty2 - ty1
    t_area = tw * th
    tcx = (tx1 + tx2) * 0.5
    tcy = (ty1 + ty2) * 0.5

    colsum_ref[...] = jnp.zeros_like(colsum_ref)

    def strip_body(s, carry):
        r0 = pl.multiple_of(s * _STRIP, _STRIP)
        px1 = pred_ref[pl.ds(r0, _STRIP), 0:1]          # (STRIP, 1)
        py1 = pred_ref[pl.ds(r0, _STRIP), 1:2]
        px2 = pred_ref[pl.ds(r0, _STRIP), 2:3]
        py2 = pred_ref[pl.ds(r0, _STRIP), 3:4]
        pw = px2 - px1
        ph = py2 - py1
        p_area = pw * ph
        pcx = (px1 + px2) * 0.5
        pcy = (py1 + py2) * 0.5

        # ---- raw IoU (pairwise via (S,1) x (1,TM) broadcasting) -----------------
        # Keep the *unclamped* intersection extents: reused for the enclosing box.
        w_raw = jnp.minimum(px2, tx2) - jnp.maximum(px1, tx1)
        h_raw = jnp.minimum(py2, ty2) - jnp.maximum(py1, ty1)
        s_inter = jnp.maximum(w_raw, 0.0) * jnp.maximum(h_raw, 0.0)
        # clamp: zero-area pairs (incl. padding fillers) give IoU 0 instead of NaN
        s_union = jnp.maximum((p_area + t_area) - s_inter, 1e-12)
        iou = s_inter * _fast_recip(s_union)

        # raw-IoU partial sum: sublane reduce runs on the XLU (the VALU is the
        # binding slot here), accumulated into a tiny (1, TM) scratch.
        colsum_ref[...] += jnp.sum(iou, axis=0, keepdims=True)

        acc = 1.0 - iou                                       # iou_loss

        # ---- SIoU distance (angle) penalty --------------------------------------
        dx = pcx - tcx
        dy = pcy - tcy
        l2 = dx * dx + dy * dy
        # sin(2*arcsin(min/hyp)) == 2*min*max/hyp^2 == 2*|dx*dy|/l2 (exact identity,
        # no sqrt/arcsin); the eps only guards 0/0 and matches the reference's
        # sqrt(l2)+1e-4 denominator in the l2 -> 0 limit.
        angle = 2.0 * jnp.abs(dx * dy) * _fast_recip(l2 + 1e-8) - 2.0

        # enclosing box from the intersection extents already in vregs:
        #   max(px2,tx2) - min(px1,tx1) == pw + tw - (min(px2,tx2) - max(px1,tx1))
        box_w = (pw + tw) - w_raw
        box_h = (ph + th) - h_raw
        rx = dx * _fast_recip(box_w)
        ry = dy * _fast_recip(box_h)
        dist = 2.0 - jnp.exp(angle * rx * rx) - jnp.exp(angle * ry * ry)
        acc = acc + 0.5 * dist

        # ---- SIoU shape penalty (theta = 4 via repeated squaring, pure VPU) -----
        dw = jnp.abs(pw - tw)
        dh = jnp.abs(ph - th)
        w_shape = 1.0 - jnp.exp(-dw * _fast_recip(jnp.maximum(pw, tw)))
        h_shape = 1.0 - jnp.exp(-dh * _fast_recip(jnp.maximum(ph, th)))
        w_shape = w_shape * w_shape
        h_shape = h_shape * h_shape
        acc = acc + 0.5 * (w_shape * w_shape + h_shape * h_shape)

        loss_ref[pl.ds(r0, _STRIP), :] = acc
        return carry

    jax.lax.fori_loop(0, tn // _STRIP, strip_body, 0)

    iousum_ref[0, 0] = jnp.sum(colsum_ref[...])


def _pad_boxes(x, rows):
    """Pad with far-away zero-area boxes: their IoU against anything is exactly 0,
    so the in-kernel raw-IoU tile sum needs no masking (padded loss entries may be
    garbage/NaN but are sliced off in the wrapper)."""
    pad = rows - x.shape[0]
    if pad == 0:
        return x
    filler = jnp.full((pad, 4), _FILL, jnp.float32)
    return jnp.concatenate([x, filler], axis=0)


def siou_pairwise(pred, target, *, tile_n=256, tile_m=512):
    """Pairwise SIoU via a tiled Pallas kernel.

    Returns:
      loss     : (N, M) float32, loss[i, j] = SIoU loss(pred box i, target box j)
      iou_mean : ()     float32, mean of the raw IoU (s_inter/s_union) over all pairs
    """
    pred = jnp.asarray(pred, jnp.float32)[..., :4]
    target = jnp.asarray(target, jnp.float32)[..., :4]
    n, m = pred.shape[0], target.shape[0]

    tm = min(tile_m, _round_up(m, 128))     # lane tile: multiple of 128 (dense stores)
    # Small-M detection workloads: grow the sublane tile so each grid step carries
    # enough work to hide the ~0.35 us per-step overhead; cap the f32 output tile at
    # 2 MiB (1024 x 512) so the double-buffered output stays v7x-VMEM-safe.
    tn = tile_n
    while tn < 1024 and tn * tm < 512 * 512:
        tn *= 2
    tn = min(tn, _round_up(n, 8))           # sublane tile: multiple of 8
    tn = max(_STRIP, (tn // _STRIP) * _STRIP)

    n_pad = _round_up(n, tn)
    m_pad = _round_up(m, tm)
    gi, gj = n_pad // tn, m_pad // tm

    pred_p = _pad_boxes(pred, n_pad)                 # (n_pad, 4)
    tgt_p = _pad_boxes(target, m_pad).T              # (4, m_pad): coords lane-aligned

    loss_p, iou_psum = pl.pallas_call(
        _siou_kernel,
        grid=(gi, gj),
        in_specs=[
            pl.BlockSpec((tn, 4), lambda i, j: (i, 0)),
            pl.BlockSpec((4, tm), lambda i, j: (0, j)),
        ],
        out_specs=(
            pl.BlockSpec((tn, tm), lambda i, j: (i, j)),
            pl.BlockSpec((1, 1), lambda i, j: (i, j), memory_space=pltpu.SMEM),
        ),
        out_shape=(
            jax.ShapeDtypeStruct((n_pad, m_pad), jnp.float32),
            jax.ShapeDtypeStruct((gi, gj), jnp.float32),
        ),
        scratch_shapes=[pltpu.VMEM((1, tm), jnp.float32)],
        compiler_params=pltpu.CompilerParams(
            dimension_semantics=("parallel", "parallel"),
            vmem_limit_bytes=48 * 1024 * 1024),
        cost_estimate=pl.CostEstimate(
            flops=100 * n_pad * m_pad,
            transcendentals=10 * n_pad * m_pad,
            bytes_accessed=4 * (n_pad * m_pad + gi * gj + 4 * (n_pad + m_pad))),
    )(pred_p, tgt_p)

    loss = loss_p[:n, :m]
    iou_mean = jnp.sum(iou_psum) / (n * m)
    return loss, iou_mean


class IouLossPallas:
    """JAX/Pallas port of MFAR-Net IouLoss (ltype='SIoU')."""

    momentum = 0.01
    alpha = 1.7
    delta = 2.7

    def __init__(self, ltype="SIoU", monotonous=False):
        # TODO(synk): only the default 'SIoU' branch is implemented as a Pallas kernel
        # (IoU/WIoU/EIoU/GIoU/DIoU/CIoU branches are not ported).
        assert ltype == "SIoU", f"ltype {ltype!r} not implemented in the Pallas port"
        self.ltype = ltype
        self.monotonous = monotonous
        self.iou_mean = jnp.float32(1.0)   # nn.Parameter(torch.tensor(1.0))
        self.training = True

    def __call__(self, pred, target, ret_iou=False, scale=False):
        loss, raw_iou_mean = siou_pairwise(pred, target)

        # For SIoU the second return is iou - penalty with loss = (1 - iou) + penalty,
        # i.e. exactly 1 - loss -> never written by the kernel; reconstructed lazily.
        iou = (1.0 - loss) if (ret_iou or scale) else None

        if scale and isinstance(self.monotonous, bool):
            beta = iou / self.iou_mean
            if self.monotonous:
                loss = loss * jnp.sqrt(beta)
            else:
                divisor = self.delta * jnp.power(self.alpha, beta - self.delta)
                loss = loss * (beta / divisor)

        if self.training:
            # EMA over the *raw* IoU (s_inter / s_union), as in the PyTorch module.
            # TODO(synk): imperative Python-side EMA; under jit/pmap this buffer
            # update will not behave like the PyTorch nn.Parameter.
            self.iou_mean = (1.0 - self.momentum) * self.iou_mean \
                + self.momentum * raw_iou_mean

        return [loss, iou] if ret_iou else loss


def _reference_siou(pred, target, theta=4):
    """Pure-JAX reference mirroring the PyTorch math exactly (incl. arcsin/sin)."""
    pred = pred.astype(jnp.float32)
    target = target.astype(jnp.float32)
    pred_xy = (pred[..., :2] + pred[..., 2:4]) / 2
    pred_wh = pred[..., 2:4] - pred[..., :2]
    target_xy = (target[..., :2] + target[..., 2:4]) / 2
    target_wh = target[..., 2:4] - target[..., :2]
    min_coord = jnp.minimum(pred[:, None, :4], target[None, :, :4])
    max_coord = jnp.maximum(pred[:, None, :4], target[None, :, :4])
    wh_inter = jnp.maximum(min_coord[..., 2:4] - max_coord[..., :2], 0.0)
    s_inter = jnp.prod(wh_inter, axis=-1)
    s_union = (jnp.prod(pred_wh, -1)[:, None] + jnp.prod(target_wh, -1)[None]
               - s_inter)
    wh_box = max_coord[..., 2:4] - min_coord[..., :2]
    d_center = pred_xy[:, None] - target_xy[None]
    l2_center = jnp.square(d_center).sum(-1)
    iou = s_inter / s_union
    iou_loss = 1.0 - iou
    angle = jnp.arcsin(jnp.min(jnp.abs(d_center), axis=-1)
                       / (jnp.sqrt(l2_center) + 0.0001))
    angle = jnp.sin(2.0 * angle) - 2.0
    dist = angle[..., None] * jnp.square(d_center / wh_box)
    dist = 2.0 - jnp.exp(dist[..., 0]) - jnp.exp(dist[..., 1])
    d_shape = jnp.abs(pred_wh[:, None, :] - target_wh[None])
    big_shape = jnp.maximum(pred_wh[:, None, :], target_wh[None])
    w_shape = 1.0 - jnp.exp(-d_shape[..., 0] / big_shape[..., 0])
    h_shape = 1.0 - jnp.exp(-d_shape[..., 1] / big_shape[..., 1])
    shape = w_shape ** theta + h_shape ** theta
    loss = iou_loss + (dist + shape) / 2
    iou_ret = iou - (dist + shape) / 2
    return loss, iou_ret, iou


if __name__ == "__main__":
    key = jax.random.PRNGKey(0)
    k1, k2, k3, k4 = jax.random.split(key, 4)

    N, M = 8, 16
    # valid boxes: (x1, y1, x2, y2) with x2 > x1, y2 > y1
    p_xy = jax.random.uniform(k1, (N, 2), minval=0.0, maxval=10.0)
    p_wh = jax.random.uniform(k2, (N, 2), minval=0.5, maxval=5.0)
    pred = jnp.concatenate([p_xy, p_xy + p_wh], axis=-1).astype(jnp.float32)

    t_xy = jax.random.uniform(k3, (M, 2), minval=0.0, maxval=10.0)
    t_wh = jax.random.uniform(k4, (M, 2), minval=0.5, maxval=5.0)
    target = jnp.concatenate([t_xy, t_xy + t_wh], axis=-1).astype(jnp.float32)

    module = IouLossPallas(ltype="SIoU", monotonous=False)
    loss, iou_ret = module(pred, target, ret_iou=True)
    loss = jax.block_until_ready(loss)

    # Sanity check against a pure-JAX reference that mirrors the PyTorch math.
    # Tolerance relaxed slightly vs. f32 eps because the kernel uses the exact
    # double-angle identity (0/0 guard instead of +1e-4 on sqrt(l2_center)) and
    # a single-Newton-step approximate reciprocal instead of true divides.
    ref_loss, ref_iou_ret, ref_raw_iou = _reference_siou(pred, target)
    np.testing.assert_allclose(np.asarray(loss), np.asarray(ref_loss),
                               rtol=2e-5, atol=1e-4)
    np.testing.assert_allclose(np.asarray(iou_ret), np.asarray(ref_iou_ret),
                               rtol=2e-5, atol=1e-4)

    # EMA of the raw IoU mean (matches the PyTorch in-place update semantics)
    ref_mean = (1.0 - IouLossPallas.momentum) * 1.0 \
        + IouLossPallas.momentum * jnp.mean(ref_raw_iou)
    np.testing.assert_allclose(np.asarray(module.iou_mean), np.asarray(ref_mean),
                               rtol=1e-5, atol=2e-6)

    print("KERNEL_OK")
</pallas_src>

<mosaic_0001>
module attributes {stable_mosaic.version = 11 : i64} {
  func.func @_siou_kernel(%arg0: i32, %arg1: i32, %arg2: memref<8x4xf32, #tpu.memory_space<vmem>>, %arg3: memref<4x128xf32, #tpu.memory_space<vmem>>, %arg4: memref<8x128xf32, #tpu.memory_space<vmem>>, %arg5: memref<1x1xf32, #tpu.memory_space<smem>>, %arg6: memref<1x128xf32, #tpu.memory_space<vmem>>) attributes {dimension_semantics = [#tpu.dimension_semantics<parallel>, #tpu.dimension_semantics<parallel>], iteration_bounds = array<i64: 1, 1>, scalar_prefetch = 0 : i64, scratch_operands = 1 : i64, tpu.core_type = #tpu.core_type<tc>, window_params = [{transform_indices = @transform_0, window_bounds = array<i64: 8, 4>}, {transform_indices = @transform_1, window_bounds = array<i64: 4, 128>}, {transform_indices = @transform_2, window_bounds = array<i64: 8, 128>}, {transform_indices = @transform_3, window_bounds = array<i64: 1, 1>}]} {
    %c0 = arith.constant 0 : index
    %c0_0 = arith.constant 0 : index
    %0 = vector.load %arg3[%c0, %c0_0] : memref<4x128xf32, #tpu.memory_space<vmem>>, vector<1x128xf32>
    %c1 = arith.constant 1 : index
    %c0_1 = arith.constant 0 : index
    %1 = vector.load %arg3[%c1, %c0_1] : memref<4x128xf32, #tpu.memory_space<vmem>>, vector<1x128xf32>
    %c2 = arith.constant 2 : index
    %c0_2 = arith.constant 0 : index
    %2 = vector.load %arg3[%c2, %c0_2] : memref<4x128xf32, #tpu.memory_space<vmem>>, vector<1x128xf32>
    %c3 = arith.constant 3 : index
    %c0_3 = arith.constant 0 : index
    %3 = vector.load %arg3[%c3, %c0_3] : memref<4x128xf32, #tpu.memory_space<vmem>>, vector<1x128xf32>
    %4 = arith.subf %2, %0 : vector<1x128xf32>
    %5 = arith.subf %3, %1 : vector<1x128xf32>
    %6 = arith.mulf %4, %5 : vector<1x128xf32>
    %7 = arith.addf %0, %2 : vector<1x128xf32>
    %cst = arith.constant 5.000000e-01 : f32
    %8 = vector.broadcast %cst : f32 to vector<1x128xf32>
    %9 = arith.mulf %7, %8 : vector<1x128xf32>
    %10 = arith.addf %1, %3 : vector<1x128xf32>
    %cst_4 = arith.constant 5.000000e-01 : f32
    %11 = vector.broadcast %cst_4 : f32 to vector<1x128xf32>
    %12 = arith.mulf %10, %11 : vector<1x128xf32>
    %cst_5 = arith.constant 0.000000e+00 : f32
    %13 = vector.broadcast %cst_5 : f32 to vector<1x128xf32>
    %c0_6 = arith.constant 0 : index
    %c0_7 = arith.constant 0 : index
    %14 = vector.load %arg6[%c0_6, %c0_7] : memref<1x128xf32, #tpu.memory_space<vmem>>, vector<1x128xf32>
    tpu.vector_store %arg6[%c0_6, %c0_7], %13 {strides = array<i32>} : memref<1x128xf32, #tpu.memory_space<vmem>>, vector<1x128xf32>,
    %c0_i32 = arith.constant 0 : i32
    %c8_i32 = arith.constant 8 : i32
    %15 = arith.muli %c0_i32, %c8_i32 : i32
    %16 = tpu.assume_multiple %15, 8 : i32
    %17 = arith.index_cast %16 : i32 to index
    %c0_8 = arith.constant 0 : index
    %18 = vector.load %arg2[%17, %c0_8] : memref<8x4xf32, #tpu.memory_space<vmem>>, vector<8x1xf32>
    %19 = arith.index_cast %16 : i32 to index
    %c1_9 = arith.constant 1 : index
    %20 = vector.load %arg2[%19, %c1_9] : memref<8x4xf32, #tpu.memory_space<vmem>>, vector<8x1xf32>
    %21 = arith.index_cast %16 : i32 to index
    %c2_10 = arith.constant 2 : index
    %22 = vector.load %arg2[%21, %c2_10] : memref<8x4xf32, #tpu.memory_space<vmem>>, vector<8x1xf32>
    %23 = arith.index_cast %16 : i32 to index
    %c3_11 = arith.constant 3 : index
    %24 = vector.load %arg2[%23, %c3_11] : memref<8x4xf32, #tpu.memory_space<vmem>>, vector<8x1xf32>
    %25 = arith.subf %22, %18 : vector<8x1xf32>
    %26 = arith.subf %24, %20 : vector<8x1xf32>
    %27 = arith.mulf %25, %26 : vector<8x1xf32>
    %28 = arith.addf %18, %22 : vector<8x1xf32>
    %cst_12 = arith.constant 5.000000e-01 : f32
    %29 = vector.broadcast %cst_12 : f32 to vector<8x1xf32>
    %30 = arith.mulf %28, %29 : vector<8x1xf32>
    %31 = arith.addf %20, %24 : vector<8x1xf32>
    %cst_13 = arith.constant 5.000000e-01 : f32
    %32 = vector.broadcast %cst_13 : f32 to vector<8x1xf32>
    %33 = arith.mulf %31, %32 : vector<8x1xf32>
    %34 = vector.broadcast %22 : vector<8x1xf32> to vector<8x128xf32>
    %35 = vector.broadcast %2 : vector<1x128xf32> to vector<8x128xf32>
    %36 = arith.minimumf %34, %35 : vector<8x128xf32>
    %37 = vector.broadcast %18 : vector<8x1xf32> to vector<8x128xf32>
    %38 = vector.broadcast %0 : vector<1x128xf32> to vector<8x128xf32>
    %39 = arith.maximumf %37, %38 : vector<8x128xf32>
    %40 = arith.subf %36, %39 : vector<8x128xf32>
    %41 = vector.broadcast %24 : vector<8x1xf32> to vector<8x128xf32>
    %42 = vector.broadcast %3 : vector<1x128xf32> to vector<8x128xf32>
    %43 = arith.minimumf %41, %42 : vector<8x128xf32>
    %44 = vector.broadcast %20 : vector<8x1xf32> to vector<8x128xf32>
    %45 = vector.broadcast %1 : vector<1x128xf32> to vector<8x128xf32>
    %46 = arith.maximumf %44, %45 : vector<8x128xf32>
    %47 = arith.subf %43, %46 : vector<8x128xf32>
    %cst_14 = arith.constant 0.000000e+00 : f32
    %48 = vector.broadcast %cst_14 : f32 to vector<8x128xf32>
    %49 = arith.maximumf %40, %48 : vector<8x128xf32>
    %cst_15 = arith.constant 0.000000e+00 : f32
    %50 = vector.broadcast %cst_15 : f32 to vector<8x128xf32>
    %51 = arith.maximumf %47, %50 : vector<8x128xf32>
    %52 = arith.mulf %49, %51 : vector<8x128xf32>
    %53 = vector.broadcast %27 : vector<8x1xf32> to vector<8x128xf32>
    %54 = vector.broadcast %6 : vector<1x128xf32> to vector<8x128xf32>
    %55 = arith.addf %53, %54 : vector<8x128xf32>
    %56 = arith.subf %55, %52 : vector<8x128xf32>
    %cst_16 = arith.constant 9.99999996E-13 : f32
    %57 = vector.broadcast %cst_16 : f32 to vector<8x128xf32>
    %58 = arith.maximumf %56, %57 : vector<8x128xf32>
    %59 = tpu.reciprocal %58 {approx = true} : vector<8x128xf32> -> vector<8x128xf32>
    %60 = arith.mulf %58, %59 : vector<8x128xf32>
    %cst_17 = arith.constant 2.000000e+00 : f32
    %61 = vector.broadcast %cst_17 : f32 to vector<8x128xf32>
    %62 = arith.subf %61, %60 : vector<8x128xf32>
    %63 = arith.mulf %59, %62 : vector<8x128xf32>
    %64 = arith.mulf %52, %63 : vector<8x128xf32>
    %c0_18 = arith.constant 0 : index
    %c0_19 = arith.constant 0 : index
    %65 = vector.load %arg6[%c0_18, %c0_19] : memref<1x128xf32, #tpu.memory_space<vmem>>, vector<1x128xf32>
    %cst_20 = arith.constant dense<0.000000e+00> : vector<128xf32>
    %66 = vector.multi_reduction <add>, %64, %cst_20 [0] : vector<8x128xf32> to vector<128xf32>
    %67 = vector.shape_cast %66 : vector<128xf32> to vector<1x128xf32>
    %68 = arith.addf %65, %67 : vector<1x128xf32>
    %c0_21 = arith.constant 0 : index
    %c0_22 = arith.constant 0 : index
    %69 = vector.load %arg6[%c0_21, %c0_22] : memref<1x128xf32, #tpu.memory_space<vmem>>, vector<1x128xf32>
    tpu.vector_store %arg6[%c0_21, %c0_22], %68 {strides = array<i32>} : memref<1x128xf32, #tpu.memory_space<vmem>>, vector<1x128xf32>,
    %cst_23 = arith.constant 1.000000e+00 : f32
    %70 = vector.broadcast %cst_23 : f32 to vector<8x128xf32>
    %71 = arith.subf %70, %64 : vector<8x128xf32>
    %72 = vector.broadcast %30 : vector<8x1xf32> to vector<8x128xf32>
    %73 = vector.broadcast %9 : vector<1x128xf32> to vector<8x128xf32>
    %74 = arith.subf %72, %73 : vector<8x128xf32>
    %75 = vector.broadcast %33 : vector<8x1xf32> to vector<8x128xf32>
    %76 = vector.broadcast %12 : vector<1x128xf32> to vector<8x128xf32>
    %77 = arith.subf %75, %76 : vector<8x128xf32>
    %78 = arith.mulf %74, %74 : vector<8x128xf32>
    %79 = arith.mulf %77, %77 : vector<8x128xf32>
    %80 = arith.addf %78, %79 : vector<8x128xf32>
    %81 = arith.mulf %74, %77 : vector<8x128xf32>
    %82 = math.absf %81 : vector<8x128xf32>
    %cst_24 = arith.constant 2.000000e+00 : f32
    %83 = vector.broadcast %cst_24 : f32 to vector<8x128xf32>
    %84 = arith.mulf %83, %82 : vector<8x128xf32>
    %cst_25 = arith.constant 9.99999993E-9 : f32
    %85 = vector.broadcast %cst_25 : f32 to vector<8x128xf32>
    %86 = arith.addf %80, %85 : vector<8x128xf32>
    %87 = tpu.reciprocal %86 {approx = true} : vector<8x128xf32> -> vector<8x128xf32>
    %88 = arith.mulf %86, %87 : vector<8x128xf32>
    %cst_26 = arith.constant 2.000000e+00 : f32
    %89 = vector.broadcast %cst_26 : f32 to vector<8x128xf32>
    %90 = arith.subf %89, %88 : vector<8x128xf32>
    %91 = arith.mulf %87, %90 : vector<8x128xf32>
    %92 = arith.mulf %84, %91 : vector<8x128xf32>
    %cst_27 = arith.constant 2.000000e+00 : f32
    %93 = vector.broadcast %cst_27 : f32 to vector<8x128xf32>
    %94 = arith.subf %92, %93 : vector<8x128xf32>
    %95 = vector.broadcast %25 : vector<8x1xf32> to vector<8x128xf32>
    %96 = vector.broadcast %4 : vector<1x128xf32> to vector<8x128xf32>
    %97 = arith.addf %95, %96 : vector<8x128xf32>
    %98 = arith.subf %97, %40 : vector<8x128xf32>
    %99 = vector.broadcast %26 : vector<8x1xf32> to vector<8x128xf32>
    %100 = vector.broadcast %5 : vector<1x128xf32> to vector<8x128xf32>
    %101 = arith.addf %99, %100 : vector<8x128xf32>
    %102 = arith.subf %101, %47 : vector<8x128xf32>
    %103 = tpu.reciprocal %98 {approx = true} : vector<8x128xf32> -> vector<8x128xf32>
    %104 = arith.mulf %98, %103 : vector<8x128xf32>
    %cst_28 = arith.constant 2.000000e+00 : f32
    %105 = vector.broadcast %cst_28 : f32 to vector<8x128xf32>
    %106 = arith.subf %105, %104 : vector<8x128xf32>
    %107 = arith.mulf %103, %106 : vector<8x128xf32>
    %108 = arith.mulf %74, %107 : vector<8x128xf32>
    %109 = tpu.reciprocal %102 {approx = true} : vector<8x128xf32> -> vector<8x128xf32>
    %110 = arith.mulf %102, %109 : vector<8x128xf32>
    %cst_29 = arith.constant 2.000000e+00 : f32
    %111 = vector.broadcast %cst_29 : f32 to vector<8x128xf32>
    %112 = arith.subf %111, %110 : vector<8x128xf32>
    %113 = arith.mulf %109, %112 : vector<8x128xf32>
    %114 = arith.mulf %77, %113 : vector<8x128xf32>
    %115 = arith.mulf %94, %108 : vector<8x128xf32>
    %116 = arith.mulf %115, %108 : vector<8x128xf32>
    %117 = math.exp %116 : vector<8x128xf32>
    %cst_30 = arith.constant 2.000000e+00 : f32
    %118 = vector.broadcast %cst_30 : f32 to vector<8x128xf32>
    %119 = arith.subf %118, %117 : vector<8x128xf32>
    %120 = arith.mulf %94, %114 : vector<8x128xf32>
    %121 = arith.mulf %120, %114 : vector<8x128xf32>
    %122 = math.exp %121 : vector<8x128xf32>
    %123 = arith.subf %119, %122 : vector<8x128xf32>
    %cst_31 = arith.constant 5.000000e-01 : f32
    %124 = vector.broadcast %cst_31 : f32 to vector<8x128xf32>
    %125 = arith.mulf %124, %123 : vector<8x128xf32>
    %126 = arith.addf %71, %125 : vector<8x128xf32>
    %127 = vector.broadcast %25 : vector<8x1xf32> to vector<8x128xf32>
    %128 = vector.broadcast %4 : vector<1x128xf32> to vector<8x128xf32>
    %129 = arith.subf %127, %128 : vector<8x128xf32>
    %130 = math.absf %129 : vector<8x128xf32>
    %131 = vector.broadcast %26 : vector<8x1xf32> to vector<8x128xf32>
    %132 = vector.broadcast %5 : vector<1x128xf32> to vector<8x128xf32>
    %133 = arith.subf %131, %132 : vector<8x128xf32>
    %134 = math.absf %133 : vector<8x128xf32>
    %cst_32 = arith.constant 0.000000e+00 : f32
    %135 = vector.broadcast %cst_32 : f32 to vector<8x128xf32>
    %136 = arith.subf %135, %130 : vector<8x128xf32>
    %137 = vector.broadcast %25 : vector<8x1xf32> to vector<8x128xf32>
    %138 = vector.broadcast %4 : vector<1x128xf32> to vector<8x128xf32>
    %139 = arith.maximumf %137, %138 : vector<8x128xf32>
    %140 = tpu.reciprocal %139 {approx = true} : vector<8x128xf32> -> vector<8x128xf32>
    %141 = arith.mulf %139, %140 : vector<8x128xf32>
    %cst_33 = arith.constant 2.000000e+00 : f32
    %142 = vector.broadcast %cst_33 : f32 to vector<8x128xf32>
    %143 = arith.subf %142, %141 : vector<8x128xf32>
    %144 = arith.mulf %140, %143 : vector<8x128xf32>
    %145 = arith.mulf %136, %144 : vector<8x128xf32>
    %146 = math.exp %145 : vector<8x128xf32>
    %cst_34 = arith.constant 1.000000e+00 : f32
    %147 = vector.broadcast %cst_34 : f32 to vector<8x128xf32>
    %148 = arith.subf %147, %146 : vector<8x128xf32>
    %cst_35 = arith.constant 0.000000e+00 : f32
    %149 = vector.broadcast %cst_35 : f32 to vector<8x128xf32>
    %150 = arith.subf %149, %134 : vector<8x128xf32>
    %151 = vector.broadcast %26 : vector<8x1xf32> to vector<8x128xf32>
    %152 = vector.broadcast %5 : vector<1x128xf32> to vector<8x128xf32>
    %153 = arith.maximumf %151, %152 : vector<8x128xf32>
    %154 = tpu.reciprocal %153 {approx = true} : vector<8x128xf32> -> vector<8x128xf32>
    %155 = arith.mulf %153, %154 : vector<8x128xf32>
    %cst_36 = arith.constant 2.000000e+00 : f32
    %156 = vector.broadcast %cst_36 : f32 to vector<8x128xf32>
    %157 = arith.subf %156, %155 : vector<8x128xf32>
    %158 = arith.mulf %154, %157 : vector<8x128xf32>
    %159 = arith.mulf %150, %158 : vector<8x128xf32>
    %160 = math.exp %159 : vector<8x128xf32>
    %cst_37 = arith.constant 1.000000e+00 : f32
    %161 = vector.broadcast %cst_37 : f32 to vector<8x128xf32>
    %162 = arith.subf %161, %160 : vector<8x128xf32>
    %163 = arith.mulf %148, %148 : vector<8x128xf32>
    %164 = arith.mulf %162, %162 : vector<8x128xf32>
    %165 = arith.mulf %163, %163 : vector<8x128xf32>
    %166 = arith.mulf %164, %164 : vector<8x128xf32>
    %167 = arith.addf %165, %166 : vector<8x128xf32>
    %cst_38 = arith.constant 5.000000e-01 : f32
    %168 = vector.broadcast %cst_38 : f32 to vector<8x128xf32>
    %169 = arith.mulf %168, %167 : vector<8x128xf32>
    %170 = arith.addf %126, %169 : vector<8x128xf32>
    %171 = arith.index_cast %16 : i32 to index
    %c0_39 = arith.constant 0 : index
    %172 = vector.load %arg4[%171, %c0_39] : memref<8x128xf32, #tpu.memory_space<vmem>>, vector<8x128xf32>
    tpu.vector_store %arg4[%171, %c0_39], %170 {strides = array<i32>} : memref<8x128xf32, #tpu.memory_space<vmem>>, vector<8x128xf32>,
    %c1_i32 = arith.constant 1 : i32
    %c0_40 = arith.constant 0 : index
    %c0_41 = arith.constant 0 : index
    %173 = vector.load %arg6[%c0_40, %c0_41] : memref<1x128xf32, #tpu.memory_space<vmem>>, vector<1x128xf32>
    %174 = vector.shape_cast %173 : vector<1x128xf32> to vector<1x1x128xf32>
    %cst_42 = arith.constant dense<0.000000e+00> : vector<1xf32>
    %175 = vector.multi_reduction <add>, %174, %cst_42 [1, 2] : vector<1x1x128xf32> to vector<1xf32>
    %176 = vector.shape_cast %175 : vector<1xf32> to vector<1x1x1xf32>
    %177 = vector.extract %176[0, 0, 0] : f32 from vector<1x1x1xf32>
    %c0_43 = arith.constant 0 : index
    %c0_44 = arith.constant 0 : index
    %178 = memref.load %arg5[%c0_43, %c0_44] : memref<1x1xf32, #tpu.memory_space<smem>>
    memref.store %177, %arg5[%c0_43, %c0_44] : memref<1x1xf32, #tpu.memory_space<smem>>
    return
  }
  func.func @transform_0(%arg0: i32, %arg1: i32) -> (i32, i32) {
    %c0_i32 = arith.constant 0 : i32
    %c0_i32_0 = arith.constant 0 : i32
    return %arg0, %c0_i32 : i32, i32
  }
  func.func @transform_1(%arg0: i32, %arg1: i32) -> (i32, i32) {
    %c0_i32 = arith.constant 0 : i32
    %c0_i32_0 = arith.constant 0 : i32
    return %c0_i32, %arg1 : i32, i32
  }
  func.func @transform_2(%arg0: i32, %arg1: i32) -> (i32, i32) {
    %c0_i32 = arith.constant 0 : i32
    return %arg0, %arg1 : i32, i32
  }
  func.func @transform_3(%arg0: i32, %arg1: i32) -> (i32, i32) {
    %c0_i32 = arith.constant 0 : i32
    return %arg0, %arg1 : i32, i32
  }
}

</mosaic_0001>

<bundles_post_ra>
// kernel: tpu_custom_call.1
= control target key start
LH: loop header
LB: loop body
LE: loop exit
PB: predicated region body
PF: predicated region fallthrough
CT: control target
= control target key end

     0   :  { %9 = vsyncpa [#allocation4], 0  ;;  %v321_v1 = vmov 2   ;;  %s322_s14 = smov 2   ;;  %s384_s0 = inlined_call_operand.vmem [shape: f32[8,4], index: 0, kind: input, shape index: {}]   ;;  %s385_s1 = inlined_call_operand.vmem [shape: f32[4,128], index: 1, kind: input, shape index: {}]   ;;  %s386_s2 = inlined_call_operand.hbm [shape: f32[8,128], index: 2, kind: output, shape index: {0}]   ;;  %s387_s3 = inlined_call_operand.hbm [shape: f32[1,1], index: 3, kind: output, shape index: {1}]  }
   0x1   :  { %v27_v0 = vld [vmem:[%s384_s0] sm:$0xff]  ;;  %248 = vset.pattern.permute.xlu1 %v321_v1 }
   0x2   :  { %29 = vrot.lane.b32.xlu0 %v27_v0, %s322_s14 }
   0x3   :  { %10 = vsyncpa [#allocation5], 0  ;;  %44 = vperm.xlu1 %248, %v27_v0   ;;  %252 = vset.pattern.permute.xlu0 %v321_v1  ;;  %v323_v2 = vmov 0   ;;  %s324_s15 = smov 126   ;;  %v325_v6 = vmov 3   ;;  %s326_s16 = smov 127  }
   0x4   :  { %250 = vset.pattern.permute.xlu2 %v325_v6  ;;  %v257_v7 = vld [vmem:[%s385_s1 + $0x2] ss:$0 sm:$0xff]  ;;  %v258_v8 = vld [vmem:[%s385_s1] ss:$0 sm:$0xff]  ;;  %v327_v11 = vmov 1   ;;  %v328_v19 = vmov 0.0  }
   0x5   :  { %57 = vperm.xlu2 %250, %v27_v0   ;;  %26 = vst [vmem:[#allocation2] sm:$0x1] %v328_v19  ;;  %v18_v23 = vld [vmem:[%s385_s1 + $0x3] sm:$0x1]  ;;  %v16_v24 = vld [vmem:[%s385_s1 + $0x1] sm:$0x1] }
   0x6   :  { %v259_v25 = vld [vmem:[%s385_s1 + $0x3] ss:$0 sm:$0xff]  ;;  %v260_v26 = vld [vmem:[%s385_s1 + $0x1] ss:$0 sm:$0xff]  ;;  %v17_v27 = vld [vmem:[%s385_s1 + $0x2] sm:$0x1]  ;;  %v20_v30 = vsub.f32 %v18_v23, %v16_v24  ;;  %v24_v44 = vadd.f32 %v18_v23, %v16_v24 }
   0x7   :  { %v15_v28 = vld [vmem:[%s385_s1] sm:$0x1]  ;;  %vm191_vm0 = vcmask 1040384   ;;  %s329_s1 = smov [#allocation3]   ;;  %s211_s8 = sshll.u32 %s386_s2, 4  ;;  %s212_s8 = int_to_ptr.hbm [resolvable:$true] %s211_s8 }
   0x8   :  { %v19_v31 = vsub.f32 %v17_v27, %v15_v28  ;;  %v133_v34 = vperm.slane %v20_v30, 0  ;;  %v22_v40 = vadd.f32 %v17_v27, %v15_v28  ;;  %v25_v50 = vmul.f32 0.5, %v24_v44  ;;  %s209_s5 = sshll.u32 %s329_s1, 4  ;;  %s220_s11 = sshll.u32 %s387_s3, 4  ;;  %s210_s5 = int_to_ptr.vmem [resolvable:$true] %s209_s5  ;;  %s221_s11 = int_to_ptr.hbm [resolvable:$true] %s220_s11 }
   0x9   :  { %s330_s13 = smov [#allocation6]  }
   0xa   :  { %v21_v35 = vmul.f32 %v20_v30, %v19_v31  ;;  %v126_v37 = vperm.slane %v19_v31, 0  ;;  %v23_v47 = vmul.f32 0.5, %v22_v40  ;;  %v107_v56 = vperm.slane %v25_v50, 0 }
   0xb   :  { %249 = vset.pattern.permute.xlu1 %v323_v2 }
   0xc   :  { %50 = vperm.xlu1 %249, %v27_v0   ;;  %v77_v43 = vperm.slane %v21_v35, 0  ;;  %v101_v53 = vperm.slane %v23_v47, 0  ;;  %v86_v44 = vld [vmem:[#allocation2] sm:$0x1] }
   0xd   :  { %251 = vset.pattern.permute.xlu2 %v327_v11 }
   0xe   :  { %63 = vperm.xlu2 %251, %v27_v0  }
  0x14   :  { %38 = vrot.lane.b32.xlu1 %v27_v0, %s324_s15 }
  0x5f   :  { %v58_v21 = vpop.permute.xlu2 %57 }
  0x60   :  { %v61_v32 = vmin.f32 %v58_v21, %v259_v25 }
  0x68   :  { %v64_v29 = vpop.permute.xlu2 %63 }
  0x69   :  { %v67_v33 = vmax.f32 %v64_v29, %v260_v26 }
  0x6b   :  { %v68_v38 = vsub.f32 %v61_v32, %v67_v33 }
  0x6d   :  { %v70_v41 = vmax.f32 %v68_v38, 0.0 }
  0x74   :  { %v30_v3 = vpop.permute.xlu0 %29 }
  0x75   :  { %v32_v4 = vsub.f32 %v27_v0, %v30_v3  ;;  %v45_v5 = vpop.permute.xlu1 %44 }
  0x76   :  { %v48_v9 = vmin.f32 %v45_v5, %v257_v7 }
  0x77   :  { %34 = vrot.lane.b32.xlu0 %v32_v4, %s326_s16 }
  0x7e   :  { %v51_v10 = vpop.permute.xlu1 %50 }
  0x7f   :  { %v54_v12 = vmax.f32 %v51_v10, %v258_v8 }
  0x81   :  { %v55_v13 = vsub.f32 %v48_v9, %v54_v12 }
  0x83   :  { %v69_v39 = vmax.f32 %v55_v13, 0.0 }
  0x85   :  { %v71_v48 = vmul.f32 %v70_v41, %v69_v39 }
  0x86   :  { %v39_v14 = vpop.permute.xlu1 %38 }
  0x87   :  { %v41_v15 = vadd.f32 %v39_v14, %v27_v0 }
  0x89   :  { %v42_v16 = vmul.f32 0.5, %v41_v15 }
  0x8b   :  { %98 = vperm.xlu1 %249, %v42_v16  }
  0x93   :  { %254 = vset.pattern.permute.xlu1 %v321_v1 }
  0x94   :  { %123 = vperm.xlu1 %254, %v32_v4  }
  0x9c   :  { %255 = vset.pattern.permute.xlu1 %v325_v6 }
  0x9d   :  { %130 = vperm.xlu1 %255, %v32_v4  }
  0xe9   :  { %v35_v17 = vpop.permute.xlu0 %34 }
  0xea   :  { %v37_v18 = vmul.f32 %v35_v17, %v32_v4 }
  0xec   :  { %74 = vperm.xlu0 %252, %v37_v18  }
  0xf4   :  { %253 = vset.pattern.permute.xlu0 %v327_v11 }
  0xf5   :  { %104 = vperm.xlu0 %253, %v42_v16  }
  0xfd   :  { %256 = vset.pattern.permute.xlu0 %v325_v6  ;;  %v99_v20 = vpop.permute.xlu1 %98 }
  0xfe   :  { %v102_v60 = vsub.f32 %v99_v20, %v101_v53 }
 0x100   :  { %v109_v1 = vmul.f32 %v102_v60, %v102_v60 }
 0x106   :  { %v124_v22 = vpop.permute.xlu1 %123 }
 0x107   :  { %v163_v45 = vmax.f32 %v124_v22, %v126_v37  ;;  %v127_v52 = vadd.f32 %v126_v37, %v124_v22  ;;  %v158_v6 = vsub.f32 %v124_v22, %v126_v37 }
 0x109   :  { %v128_v58 = vsub.f32 %v127_v52, %v55_v13  ;;  %v159_v15 = vand.u32 2147483647, %v158_v6 }
 0x10b   :  { %v162_v22 = vsub.f32 0.0, %v159_v15 }
 0x10f   :  { %v131_v36 = vpop.permute.xlu1 %130 }
 0x110   :  { %v173_v42 = vmax.f32 %v131_v36, %v133_v34  ;;  %v134_v55 = vadd.f32 %v133_v34, %v131_v36  ;;  %v160_v3 = vsub.f32 %v131_v36, %v133_v34 }
 0x112   :  { %261 = vrcp.f32 %v173_v42  ;;  %v135_v62 = vsub.f32 %v134_v55, %v68_v38  ;;  %v161_v11 = vand.u32 2147483647, %v160_v3 }
 0x113   :  { %263 = vrcp.f32 %v163_v45 }
 0x114   :  { %v172_v20 = vsub.f32 0.0, %v161_v11 }
 0x118   :  { %v262_v57 = vpop.eup %261 }
 0x119   :  { %v264_v59 = vpop.eup %263  ;;  %v175_v63 = vmul.f32 %v262_v57, %v173_v42 }
 0x11a   :  { %v165_v2 = vmul.f32 %v264_v59, %v163_v45 }
 0x11b   :  { %v176_v7 = vsub.f32 2.0, %v175_v63 }
 0x11c   :  { %v166_v10 = vsub.f32 2.0, %v165_v2 }
 0x11d   :  { %v177_v16 = vmul.f32 %v262_v57, %v176_v7 }
 0x11e   :  { %v167_v19 = vmul.f32 %v264_v59, %v166_v10 }
 0x11f   :  { %v178_v25 = vmul.f32 %v177_v16, %v172_v20 }
 0x120   :  { %v168_v29 = vmul.f32 %v167_v19, %v162_v22 }
 0x121   :  { %v179_v34 = vmul.f32 1.442695, %v178_v25 }
 0x122   :  { %v169_v38 = vmul.f32 1.442695, %v168_v29 }
 0x15e   :  { %v75_v46 = vpop.permute.xlu0 %74 }
 0x15f   :  { %v78_v49 = vadd.f32 %v77_v43, %v75_v46 }
 0x161   :  { %v79_v51 = vsub.f32 %v78_v49, %v71_v48 }
 0x163   :  { %v80_v54 = vmax.f32 %v79_v51, 1e-12 }
 0x165   :  { %265 = vrcp.f32 %v80_v54 }
 0x166   :  { %267 = vrcp.f32 %v128_v58 }
 0x167   :  { %v105_v61 = vpop.permute.xlu0 %104  ;;  %269 = vrcp.f32 %v135_v62 }
 0x168   :  { %v108_v0 = vsub.f32 %v105_v61, %v107_v56 }
 0x16a   :  { %v110_v4 = vmul.f32 %v108_v0, %v108_v0  ;;  %v112_v24 = vmul.f32 %v108_v0, %v102_v60 }
 0x16b   :  { %v266_v5 = vpop.eup %265 }
 0x16c   :  { %v82_v8 = vmul.f32 %v266_v5, %v80_v54  ;;  %v111_v9 = vadd.f32 %v110_v4, %v109_v1  ;;  %v268_v14 = vpop.eup %267  ;;  %v113_v32 = vand.u32 2147483647, %v112_v24 }
 0x16d   :  { %v270_v18 = vpop.eup %269  ;;  %v137_v23 = vmul.f32 %v268_v14, %v128_v58 }
 0x16e   :  { %v83_v12 = vsub.f32 2.0, %v82_v8  ;;  %v115_v13 = vadd.f32 1e-08, %v111_v9  ;;  %v142_v27 = vmul.f32 %v270_v18, %v135_v62  ;;  %v114_v41 = vmul.f32 2.0, %v113_v32 }
 0x16f   :  { %v138_v31 = vsub.f32 2.0, %v137_v23 }
 0x170   :  { %v84_v17 = vmul.f32 %v266_v5, %v83_v12  ;;  %271 = vrcp.f32 %v115_v13  ;;  %v143_v36 = vsub.f32 2.0, %v142_v27 }
 0x171   :  { %v139_v40 = vmul.f32 %v268_v14, %v138_v31  ;;  %273 = vpow2.f32 %v179_v34 }
 0x172   :  { %v85_v21 = vmul.f32 %v84_v17, %v71_v48  ;;  %v144_v46 = vmul.f32 %v270_v18, %v143_v36  ;;  %275 = vpow2.f32 %v169_v38 }
 0x173   :  { %v140_v48 = vmul.f32 %v139_v40, %v102_v60 }
 0x174   :  { %v87_v26 = vrot.slane %v85_v21, 4  ;;  %v145_v50 = vmul.f32 %v144_v46, %v108_v0  ;;  %v95_v9 = vsub.f32 1.0, %v85_v21 }
 0x176   :  { %v272_v28 = vpop.eup %271  ;;  %v88_v30 = vadd.f32 %v87_v26, %v85_v21 }
 0x177   :  { %v117_v33 = vmul.f32 %v272_v28, %v115_v13  ;;  %v274_v54 = vpop.eup %273 }
 0x178   :  { %v89_v35 = vrot.slane %v88_v30, 2  ;;  %v276_v57 = vpop.eup %275  ;;  %v181_v58 = vsub.f32 1.0, %v274_v54 }
 0x179   :  { %v118_v37 = vsub.f32 2.0, %v117_v33  ;;  %v171_v62 = vsub.f32 1.0, %v276_v57 }
 0x17a   :  { %v90_v39 = vadd.f32 %v89_v35, %v88_v30  ;;  %v183_v1 = vmul.f32 %v181_v58, %v181_v58 }
 0x17b   :  { %v119_v42 = vmul.f32 %v272_v28, %v118_v37  ;;  %v182_v0 = vmul.f32 %v171_v62, %v171_v62 }
 0x17c   :  { %v91_v43 = vrot.slane %v90_v39, 1  ;;  %v185_v2 = vmul.f32 %v183_v1, %v183_v1 }
 0x17d   :  { %v120_v45 = vmul.f32 %v119_v42, %v114_v41  ;;  %v184_v5 = vmul.f32 %v182_v0, %v182_v0 }
 0x17e   :  { %v92_v47 = vadd.f32 %v91_v43, %v90_v39 }
 0x17f   :  { %v235_v49 = vadd.f32 -2.0, %v120_v45  ;;  %v186_v8 = vadd.f32 %v185_v2, %v184_v5 }
 0x180   :  { %v93_v51 = vadd.f32 %v92_v47, %v86_v44 }
 0x181   :  { %v146_v52 = vmul.f32 %v235_v49, %v140_v48  ;;  %v151_v53 = vmul.f32 %v235_v49, %v145_v50  ;;  %v187_v12 = vmul.f32 0.5, %v186_v8 }
 0x182   :  { %94 = vst [vmem:[#allocation2] sm:$0x1] %v93_v51 }
 0x183   :  { %v152_v55 = vmul.f32 %v151_v53, %v145_v50  ;;  %v147_v56 = vmul.f32 %v146_v52, %v140_v48 }
 0x185   :  { %v148_v59 = vmul.f32 1.442695, %v147_v56  ;;  %v153_v61 = vmul.f32 1.442695, %v152_v55 }
 0x187   :  { %277 = vpow2.f32 %v148_v59 }
 0x188   :  { %279 = vpow2.f32 %v153_v61 }
 0x189   :  { %v190_v63 = vld [vmem:[#allocation2] sm:$0x1] }
 0x18a   :  { %v192_v60 = vsel %vm191_vm0, %v190_v63, 0.0 }
 0x18b   :  { %193 = vadd.xlane.f32.xlu2 %v192_v60 }
 0x18d   :  { %v278_v3 = vpop.eup %277 }
 0x18e   :  { %v150_v4 = vsub.f32 2.0, %v278_v3  ;;  %v280_v6 = vpop.eup %279 }
 0x190   :  { %v155_v7 = vsub.f32 %v150_v4, %v280_v6 }
 0x192   :  { %v156_v10 = vmul.f32 0.5, %v155_v7 }
 0x194   :  { %v157_v11 = vadd.f32 %v156_v10, %v95_v9 }
 0x196   :  { %v188_v13 = vadd.f32 %v187_v12, %v157_v11 }
 0x198   :  { %189 = vst [vmem:[#allocation3] sm:$0xff] %v188_v13 }
 0x199   :  { %214 = dma.vmem_to_hbm [thread:$0]  %s210_s5, 128, %s212_s8, [#allocation4]  }
 0x1fe   :  { %v194_v14 = vpop.xlane.xlu2 %193 }
 0x1ff   :  { %v195_v15 = vrot.slane %v194_v14, 4 }
 0x201   :  { %v196_v16 = vadd.f32 %v195_v15, %v194_v14 }
 0x203   :  { %v197_v17 = vrot.slane %v196_v16, 2 }
 0x205   :  { %v198_v18 = vadd.f32 %v197_v17, %v196_v16 }
 0x207   :  { %v199_v19 = vrot.slane %v198_v18, 1 }
 0x209   :  { %v200_v20 = vadd.f32 %v199_v19, %v198_v18 }
 0x20b   :  { %236 = vpush %v200_v20 }
 0x23c   :  { %s237_s12 = spop %236 }
 0x23d   :  { %203 = sst [smem:[#allocation6]] %s237_s12 }
 0x23e   :  { %223 = dma.smem_to_hbm %s330_s13, 16, %s221_s11, [#allocation5]  }
 0x23f   :  { %317 = dma.done.wait [#allocation4], 128  }
 0x240   :  { %318 = vsyncadd [#allocation4], 4294967168 }
 0x241   :  { %319 = dma.done.wait [#allocation5], 16  }
 0x242   :  { %320 = vsyncadd [#allocation5], 4294967280 }
 0x243   :  { %232 = sfence }
 0x244   :  { %233 = vsyncpa [#allocation4], 1 }
 0x245   :  { %234 = vsyncpa [#allocation5], 1 }

</bundles_post_ra>
